<compile_context>
chip_gen: v7x
topology: tpu7x:2x2x1
jax: 0.10.0
libtpu: 0.0.40
codegen_flags: <defaults>
</compile_context>

<pallas_src>
import functools

import jax
import jax.numpy as jnp
from jax import lax
from jax.experimental import pallas as pl
from jax.experimental.pallas import tpu as pltpu


def attention_kernel(lab_i_ref, lab_j_ref, x_ref, wq_ref, wk_ref, wv_ref,
                     wo_ref, bo_ref, o_ref, *, heads):
    b = x_ref.shape[0]
    dim = o_ref.shape[1]

    # Same-label mask built in-kernel: pure VPU compares on two tiny vectors.
    lab_i = jnp.broadcast_to(lab_i_ref[...], (b, b))      # (b, 1) -> (b, b)
    lab_j = jnp.broadcast_to(lab_j_ref[...], (b, b))      # (1, b) -> (b, b)
    mask = (lab_i == lab_j).astype(jnp.float32)           # (b, b)

    # MXU operands in bf16, f32 accumulation; elementwise math stays f32.
    xb = x_ref[...].astype(jnp.bfloat16)                  # (b, dim)
    wq = wq_ref[...].astype(jnp.bfloat16)                 # (heads, dim, d_head), pre-scaled
    wk = wk_ref[...].astype(jnp.bfloat16)
    wv = wv_ref[...].astype(jnp.bfloat16)
    wo = wo_ref[...].astype(jnp.bfloat16)                 # (heads, d_head, dim)

    # Output accumulator starts from the to_out bias (Dropout(0.0) is identity).
    acc = jnp.broadcast_to(bo_ref[...].astype(jnp.float32), (b, dim))

    for h in range(heads):
        # Per-head projections: each result is lane-aligned at offset 0.
        qh = jnp.dot(xb, wq[h], preferred_element_type=jnp.float32)   # (b, d_head)
        kh = jnp.dot(xb, wk[h], preferred_element_type=jnp.float32)
        vh = jnp.dot(xb, wv[h], preferred_element_type=jnp.float32)

        # q·kᵀ by contracting the shared last dims -> no explicit transpose.
        # (scale already folded into wq host-side)
        dots = lax.dot_general(
            qh.astype(jnp.bfloat16), kh.astype(jnp.bfloat16),
            dimension_numbers=(((1,), (1,)), ((), ())),
            preferred_element_type=jnp.float32)                       # (b, b)

        # Numerically stable softmax in f32; reciprocal on the EUP slot.
        dots = dots - jnp.max(dots, axis=-1, keepdims=True)
        e = jnp.exp(dots)
        attn = e * pl.reciprocal(jnp.sum(e, axis=-1, keepdims=True), approx=True)

        # Label mask applied AFTER softmax (rows intentionally not re-normalized,
        # matching the PyTorch reference).
        attn1 = attn * mask

        head_out = jnp.dot(attn1.astype(jnp.bfloat16), vh.astype(jnp.bfloat16),
                           preferred_element_type=jnp.float32)        # (b, d_head)

        # Per-head output projection accumulated straight into (b, dim):
        # avoids the lane-axis concat of 16-wide chunks.
        acc = acc + jnp.dot(head_out.astype(jnp.bfloat16), wo[h],
                            preferred_element_type=jnp.float32)

    o_ref[...] = acc.astype(o_ref.dtype)


def attention_forward(x, labels, w_qkv, w_out, b_out, *, heads, dim_head):
    b, dim = x.shape
    inner_dim = heads * dim_head
    scale = dim_head ** -0.5

    # Parameter re-layout (one-time host/XLA glue): per-head weight slabs so
    # all in-kernel matmul operands start at lane offset 0.  The softmax scale
    # is folded into the Q weights (f32, before the in-kernel bf16 cast).
    w_q, w_k, w_v = jnp.split(w_qkv, 3, axis=-1)                        # (dim, inner)
    wq3 = (w_q * scale).reshape(dim, heads, dim_head).transpose(1, 0, 2)  # (h, dim, d)
    wk3 = w_k.reshape(dim, heads, dim_head).transpose(1, 0, 2)
    wv3 = w_v.reshape(dim, heads, dim_head).transpose(1, 0, 2)
    wo3 = w_out.reshape(heads, dim_head, dim)                           # (h, d, dim)
    bo = b_out.reshape(1, dim)

    lab_i = labels.astype(jnp.int32).reshape(b, 1)
    lab_j = labels.astype(jnp.int32).reshape(1, b)

    kernel = functools.partial(attention_kernel, heads=heads)

    flops = (2 * b * dim * 3 * inner_dim            # q/k/v projections
             + heads * (2 * b * b * dim_head) * 2   # dots + attn @ v
             + 2 * b * inner_dim * dim)             # output projection
    bytes_accessed = 4 * (x.size + w_qkv.size + w_out.size + b_out.size
                          + 2 * b + b * dim)

    vmem = pl.BlockSpec(memory_space=pltpu.MemorySpace.VMEM)
    return pl.pallas_call(
        kernel,
        out_shape=jax.ShapeDtypeStruct((b, dim), jnp.float32),
        in_specs=[vmem] * 8,
        out_specs=vmem,
        cost_estimate=pl.CostEstimate(
            flops=flops,
            transcendentals=heads * b * b + heads * b,
            bytes_accessed=bytes_accessed),
    )(lab_i, lab_j, x, wq3, wk3, wv3, wo3, bo)
    # TODO(synk): if this kernel is scaled to large b/dim, add a "parallel"
    # grid axis over query rows (v7x dual-TC) and re-tile for 64 MiB VMEM.


def attention_reference(x, labels, w_qkv, w_out, b_out, *, heads, dim_head):
    """Pure-JAX re-statement of the PyTorch forward with the same bf16 MXU
    operand / f32 accumulation policy as the kernel (softmax in f32)."""
    b, dim = x.shape
    inner_dim = heads * dim_head
    scale = dim_head ** -0.5
    bf = jnp.bfloat16
    mask = (labels[:, None] == labels[None, :]).astype(jnp.float32)

    qkv = jnp.dot(x.astype(bf), w_qkv.astype(bf),
                  preferred_element_type=jnp.float32)
    q, k, v = jnp.split(qkv, 3, axis=-1)
    # rearrange 'b (h d) -> h b d'
    q = q.reshape(b, heads, dim_head).transpose(1, 0, 2)
    k = k.reshape(b, heads, dim_head).transpose(1, 0, 2)
    v = v.reshape(b, heads, dim_head).transpose(1, 0, 2)

    dots = jnp.einsum('hid,hjd->hij', q.astype(bf), k.astype(bf),
                      preferred_element_type=jnp.float32) * scale
    attn = jax.nn.softmax(dots, axis=-1)
    attn1 = attn * mask[None, :, :]
    out = jnp.einsum('hij,hjd->hid', attn1.astype(bf), v.astype(bf),
                     preferred_element_type=jnp.float32)
    out = out.transpose(1, 0, 2).reshape(b, inner_dim)   # 'h i d -> i (h d)'
    return jnp.dot(out.astype(bf), w_out.astype(bf),
                   preferred_element_type=jnp.float32) + b_out[None, :]


if __name__ == "__main__":
    # small, deterministic problem (module with dim=32, heads=4, dim_head=16)
    b, dim = 8, 32
    heads, dim_head = 4, 16
    inner_dim = heads * dim_head

    key = jax.random.PRNGKey(0)
    kx, kl, kq, ko, kb = jax.random.split(key, 5)

    x = jax.random.normal(kx, (b, dim), dtype=jnp.float32)
    labels = jax.random.randint(kl, (b,), 0, 3, dtype=jnp.int32)
    # synthetic parameters (shapes from the nn.Linear defs; weights pre-transposed
    # vs. torch Linear.weight so y = x @ W)
    w_qkv = jax.random.normal(kq, (dim, 3 * inner_dim), dtype=jnp.float32) * (dim ** -0.5)
    w_out = jax.random.normal(ko, (inner_dim, dim), dtype=jnp.float32) * (inner_dim ** -0.5)
    b_out = jax.random.normal(kb, (dim,), dtype=jnp.float32) * 0.02

    out = attention_forward(x, labels, w_qkv, w_out, b_out,
                            heads=heads, dim_head=dim_head)
    out = jax.block_until_ready(out)

    ref = attention_reference(x, labels, w_qkv, w_out, b_out,
                              heads=heads, dim_head=dim_head)
    assert out.shape == (b, dim)
    # Tolerance covers the approx-EUP reciprocal vs. exact divide; both sides
    # use the same bf16-operand / f32-accumulate matmul policy.
    assert jnp.allclose(out, ref, atol=1e-2, rtol=1e-2), "mismatch vs pure-JAX reference"

    print("KERNEL_OK")
</pallas_src>

<mosaic_0001>
module attributes {stable_mosaic.version = 11 : i64} {
  func.func @attention_kernel(%arg0: memref<8x1xi32, #tpu.memory_space<vmem>>, %arg1: memref<1x8xi32, #tpu.memory_space<vmem>>, %arg2: memref<8x32xf32, #tpu.memory_space<vmem>>, %arg3: memref<4x32x16xf32, #tpu.memory_space<vmem>>, %arg4: memref<4x32x16xf32, #tpu.memory_space<vmem>>, %arg5: memref<4x32x16xf32, #tpu.memory_space<vmem>>, %arg6: memref<4x16x32xf32, #tpu.memory_space<vmem>>, %arg7: memref<1x32xf32, #tpu.memory_space<vmem>>, %arg8: memref<8x32xf32, #tpu.memory_space<vmem>>) attributes {dimension_semantics = [], scalar_prefetch = 0 : i64, scratch_operands = 0 : i64, tpu.core_type = #tpu.core_type<tc>} {
    %c0 = arith.constant 0 : index
    %c0_0 = arith.constant 0 : index
    %0 = vector.load %arg0[%c0, %c0_0] : memref<8x1xi32, #tpu.memory_space<vmem>>, vector<8x1xi32>
    %1 = vector.shape_cast %0 : vector<8x1xi32> to vector<8x1xi32>
    %2 = vector.broadcast %1 : vector<8x1xi32> to vector<8x8xi32>
    %c0_1 = arith.constant 0 : index
    %c0_2 = arith.constant 0 : index
    %3 = vector.load %arg1[%c0_1, %c0_2] : memref<1x8xi32, #tpu.memory_space<vmem>>, vector<1x8xi32>
    %4 = vector.shape_cast %3 : vector<1x8xi32> to vector<1x8xi32>
    %5 = vector.broadcast %4 : vector<1x8xi32> to vector<8x8xi32>
    %6 = arith.cmpi eq, %2, %5 : vector<8x8xi32>
    %7 = arith.extui %6 : vector<8x8xi1> to vector<8x8xi32>
    %8 = arith.sitofp %7 : vector<8x8xi32> to vector<8x8xf32>
    %c0_3 = arith.constant 0 : index
    %c0_4 = arith.constant 0 : index
    %9 = vector.load %arg2[%c0_3, %c0_4] : memref<8x32xf32, #tpu.memory_space<vmem>>, vector<8x32xf32>
    %10 = arith.truncf %9 : vector<8x32xf32> to vector<8x32xbf16>
    %c0_5 = arith.constant 0 : index
    %c0_6 = arith.constant 0 : index
    %c0_7 = arith.constant 0 : index
    %11 = vector.load %arg3[%c0_5, %c0_6, %c0_7] : memref<4x32x16xf32, #tpu.memory_space<vmem>>, vector<4x32x16xf32>
    %12 = arith.truncf %11 : vector<4x32x16xf32> to vector<4x32x16xbf16>
    %c0_8 = arith.constant 0 : index
    %c0_9 = arith.constant 0 : index
    %c0_10 = arith.constant 0 : index
    %13 = vector.load %arg4[%c0_8, %c0_9, %c0_10] : memref<4x32x16xf32, #tpu.memory_space<vmem>>, vector<4x32x16xf32>
    %14 = arith.truncf %13 : vector<4x32x16xf32> to vector<4x32x16xbf16>
    %c0_11 = arith.constant 0 : index
    %c0_12 = arith.constant 0 : index
    %c0_13 = arith.constant 0 : index
    %15 = vector.load %arg5[%c0_11, %c0_12, %c0_13] : memref<4x32x16xf32, #tpu.memory_space<vmem>>, vector<4x32x16xf32>
    %16 = arith.truncf %15 : vector<4x32x16xf32> to vector<4x32x16xbf16>
    %c0_14 = arith.constant 0 : index
    %c0_15 = arith.constant 0 : index
    %c0_16 = arith.constant 0 : index
    %17 = vector.load %arg6[%c0_14, %c0_15, %c0_16] : memref<4x16x32xf32, #tpu.memory_space<vmem>>, vector<4x16x32xf32>
    %18 = arith.truncf %17 : vector<4x16x32xf32> to vector<4x16x32xbf16>
    %c0_17 = arith.constant 0 : index
    %c0_18 = arith.constant 0 : index
    %19 = vector.load %arg7[%c0_17, %c0_18] : memref<1x32xf32, #tpu.memory_space<vmem>>, vector<1x32xf32>
    %20 = vector.shape_cast %19 : vector<1x32xf32> to vector<1x32xf32>
    %21 = vector.broadcast %20 : vector<1x32xf32> to vector<8x32xf32>
    %22 = vector.extract_strided_slice %12 {offsets = [0, 0, 0], sizes = [1, 32, 16], strides = [1, 1, 1]} : vector<4x32x16xbf16> to vector<1x32x16xbf16>
    %23 = vector.shape_cast %22 : vector<1x32x16xbf16> to vector<32x16xbf16>
    %cst = arith.constant dense<0.000000e+00> : vector<8x16xf32>
    %24 = tpu.matmul %10, %23, %cst {dimension_numbers = #tpu.dot_dimension_numbers<[1], [0], [0], [1], [0, 0, 1, 1], [], []>} : vector<8x32xbf16>, vector<32x16xbf16>, vector<8x16xf32> -> vector<8x16xf32>
    %25 = vector.extract_strided_slice %14 {offsets = [0, 0, 0], sizes = [1, 32, 16], strides = [1, 1, 1]} : vector<4x32x16xbf16> to vector<1x32x16xbf16>
    %26 = vector.shape_cast %25 : vector<1x32x16xbf16> to vector<32x16xbf16>
    %cst_19 = arith.constant dense<0.000000e+00> : vector<8x16xf32>
    %27 = tpu.matmul %10, %26, %cst_19 {dimension_numbers = #tpu.dot_dimension_numbers<[1], [0], [0], [1], [0, 0, 1, 1], [], []>} : vector<8x32xbf16>, vector<32x16xbf16>, vector<8x16xf32> -> vector<8x16xf32>
    %28 = vector.extract_strided_slice %16 {offsets = [0, 0, 0], sizes = [1, 32, 16], strides = [1, 1, 1]} : vector<4x32x16xbf16> to vector<1x32x16xbf16>
    %29 = vector.shape_cast %28 : vector<1x32x16xbf16> to vector<32x16xbf16>
    %cst_20 = arith.constant dense<0.000000e+00> : vector<8x16xf32>
    %30 = tpu.matmul %10, %29, %cst_20 {dimension_numbers = #tpu.dot_dimension_numbers<[1], [0], [0], [1], [0, 0, 1, 1], [], []>} : vector<8x32xbf16>, vector<32x16xbf16>, vector<8x16xf32> -> vector<8x16xf32>
    %31 = arith.truncf %24 : vector<8x16xf32> to vector<8x16xbf16>
    %32 = arith.truncf %27 : vector<8x16xf32> to vector<8x16xbf16>
    %cst_21 = arith.constant dense<0.000000e+00> : vector<8x8xf32>
    %33 = tpu.matmul %31, %32, %cst_21 {dimension_numbers = #tpu.dot_dimension_numbers<[1], [1], [0], [0], [0, 0, 1, 0], [], []>} : vector<8x16xbf16>, vector<8x16xbf16>, vector<8x8xf32> -> vector<8x8xf32>
    %cst_22 = arith.constant dense<0xFF800000> : vector<8xf32>
    %34 = vector.multi_reduction <maximumf>, %33, %cst_22 [1] : vector<8x8xf32> to vector<8xf32>
    %35 = vector.shape_cast %34 : vector<8xf32> to vector<8x1xf32>
    %36 = vector.broadcast %35 : vector<8x1xf32> to vector<8x8xf32>
    %37 = arith.subf %33, %36 : vector<8x8xf32>
    %38 = math.exp %37 : vector<8x8xf32>
    %cst_23 = arith.constant dense<0.000000e+00> : vector<8xf32>
    %39 = vector.multi_reduction <add>, %38, %cst_23 [1] : vector<8x8xf32> to vector<8xf32>
    %40 = vector.shape_cast %39 : vector<8xf32> to vector<8x1xf32>
    %41 = tpu.reciprocal %40 {approx = true} : vector<8x1xf32> -> vector<8x1xf32>
    %42 = vector.broadcast %41 : vector<8x1xf32> to vector<8x8xf32>
    %43 = arith.mulf %38, %42 : vector<8x8xf32>
    %44 = arith.mulf %43, %8 : vector<8x8xf32>
    %45 = arith.truncf %44 : vector<8x8xf32> to vector<8x8xbf16>
    %46 = arith.truncf %30 : vector<8x16xf32> to vector<8x16xbf16>
    %cst_24 = arith.constant dense<0.000000e+00> : vector<8x16xf32>
    %47 = tpu.matmul %45, %46, %cst_24 {dimension_numbers = #tpu.dot_dimension_numbers<[1], [0], [0], [1], [0, 0, 1, 1], [], []>} : vector<8x8xbf16>, vector<8x16xbf16>, vector<8x16xf32> -> vector<8x16xf32>
    %48 = arith.truncf %47 : vector<8x16xf32> to vector<8x16xbf16>
    %49 = vector.extract_strided_slice %18 {offsets = [0, 0, 0], sizes = [1, 16, 32], strides = [1, 1, 1]} : vector<4x16x32xbf16> to vector<1x16x32xbf16>
    %50 = vector.shape_cast %49 : vector<1x16x32xbf16> to vector<16x32xbf16>
    %cst_25 = arith.constant dense<0.000000e+00> : vector<8x32xf32>
    %51 = tpu.matmul %48, %50, %cst_25 {dimension_numbers = #tpu.dot_dimension_numbers<[1], [0], [0], [1], [0, 0, 1, 1], [], []>} : vector<8x16xbf16>, vector<16x32xbf16>, vector<8x32xf32> -> vector<8x32xf32>
    %52 = arith.addf %21, %51 : vector<8x32xf32>
    %53 = vector.extract_strided_slice %12 {offsets = [1, 0, 0], sizes = [1, 32, 16], strides = [1, 1, 1]} : vector<4x32x16xbf16> to vector<1x32x16xbf16>
    %54 = vector.shape_cast %53 : vector<1x32x16xbf16> to vector<32x16xbf16>
    %cst_26 = arith.constant dense<0.000000e+00> : vector<8x16xf32>
    %55 = tpu.matmul %10, %54, %cst_26 {dimension_numbers = #tpu.dot_dimension_numbers<[1], [0], [0], [1], [0, 0, 1, 1], [], []>} : vector<8x32xbf16>, vector<32x16xbf16>, vector<8x16xf32> -> vector<8x16xf32>
    %56 = vector.extract_strided_slice %14 {offsets = [1, 0, 0], sizes = [1, 32, 16], strides = [1, 1, 1]} : vector<4x32x16xbf16> to vector<1x32x16xbf16>
    %57 = vector.shape_cast %56 : vector<1x32x16xbf16> to vector<32x16xbf16>
    %cst_27 = arith.constant dense<0.000000e+00> : vector<8x16xf32>
    %58 = tpu.matmul %10, %57, %cst_27 {dimension_numbers = #tpu.dot_dimension_numbers<[1], [0], [0], [1], [0, 0, 1, 1], [], []>} : vector<8x32xbf16>, vector<32x16xbf16>, vector<8x16xf32> -> vector<8x16xf32>
    %59 = vector.extract_strided_slice %16 {offsets = [1, 0, 0], sizes = [1, 32, 16], strides = [1, 1, 1]} : vector<4x32x16xbf16> to vector<1x32x16xbf16>
    %60 = vector.shape_cast %59 : vector<1x32x16xbf16> to vector<32x16xbf16>
    %cst_28 = arith.constant dense<0.000000e+00> : vector<8x16xf32>
    %61 = tpu.matmul %10, %60, %cst_28 {dimension_numbers = #tpu.dot_dimension_numbers<[1], [0], [0], [1], [0, 0, 1, 1], [], []>} : vector<8x32xbf16>, vector<32x16xbf16>, vector<8x16xf32> -> vector<8x16xf32>
    %62 = arith.truncf %55 : vector<8x16xf32> to vector<8x16xbf16>
    %63 = arith.truncf %58 : vector<8x16xf32> to vector<8x16xbf16>
    %cst_29 = arith.constant dense<0.000000e+00> : vector<8x8xf32>
    %64 = tpu.matmul %62, %63, %cst_29 {dimension_numbers = #tpu.dot_dimension_numbers<[1], [1], [0], [0], [0, 0, 1, 0], [], []>} : vector<8x16xbf16>, vector<8x16xbf16>, vector<8x8xf32> -> vector<8x8xf32>
    %cst_30 = arith.constant dense<0xFF800000> : vector<8xf32>
    %65 = vector.multi_reduction <maximumf>, %64, %cst_30 [1] : vector<8x8xf32> to vector<8xf32>
    %66 = vector.shape_cast %65 : vector<8xf32> to vector<8x1xf32>
    %67 = vector.broadcast %66 : vector<8x1xf32> to vector<8x8xf32>
    %68 = arith.subf %64, %67 : vector<8x8xf32>
    %69 = math.exp %68 : vector<8x8xf32>
    %cst_31 = arith.constant dense<0.000000e+00> : vector<8xf32>
    %70 = vector.multi_reduction <add>, %69, %cst_31 [1] : vector<8x8xf32> to vector<8xf32>
    %71 = vector.shape_cast %70 : vector<8xf32> to vector<8x1xf32>
    %72 = tpu.reciprocal %71 {approx = true} : vector<8x1xf32> -> vector<8x1xf32>
    %73 = vector.broadcast %72 : vector<8x1xf32> to vector<8x8xf32>
    %74 = arith.mulf %69, %73 : vector<8x8xf32>
    %75 = arith.mulf %74, %8 : vector<8x8xf32>
    %76 = arith.truncf %75 : vector<8x8xf32> to vector<8x8xbf16>
    %77 = arith.truncf %61 : vector<8x16xf32> to vector<8x16xbf16>
    %cst_32 = arith.constant dense<0.000000e+00> : vector<8x16xf32>
    %78 = tpu.matmul %76, %77, %cst_32 {dimension_numbers = #tpu.dot_dimension_numbers<[1], [0], [0], [1], [0, 0, 1, 1], [], []>} : vector<8x8xbf16>, vector<8x16xbf16>, vector<8x16xf32> -> vector<8x16xf32>
    %79 = arith.truncf %78 : vector<8x16xf32> to vector<8x16xbf16>
    %80 = vector.extract_strided_slice %18 {offsets = [1, 0, 0], sizes = [1, 16, 32], strides = [1, 1, 1]} : vector<4x16x32xbf16> to vector<1x16x32xbf16>
    %81 = vector.shape_cast %80 : vector<1x16x32xbf16> to vector<16x32xbf16>
    %cst_33 = arith.constant dense<0.000000e+00> : vector<8x32xf32>
    %82 = tpu.matmul %79, %81, %cst_33 {dimension_numbers = #tpu.dot_dimension_numbers<[1], [0], [0], [1], [0, 0, 1, 1], [], []>} : vector<8x16xbf16>, vector<16x32xbf16>, vector<8x32xf32> -> vector<8x32xf32>
    %83 = arith.addf %52, %82 : vector<8x32xf32>
    %84 = vector.extract_strided_slice %12 {offsets = [2, 0, 0], sizes = [1, 32, 16], strides = [1, 1, 1]} : vector<4x32x16xbf16> to vector<1x32x16xbf16>
    %85 = vector.shape_cast %84 : vector<1x32x16xbf16> to vector<32x16xbf16>
    %cst_34 = arith.constant dense<0.000000e+00> : vector<8x16xf32>
    %86 = tpu.matmul %10, %85, %cst_34 {dimension_numbers = #tpu.dot_dimension_numbers<[1], [0], [0], [1], [0, 0, 1, 1], [], []>} : vector<8x32xbf16>, vector<32x16xbf16>, vector<8x16xf32> -> vector<8x16xf32>
    %87 = vector.extract_strided_slice %14 {offsets = [2, 0, 0], sizes = [1, 32, 16], strides = [1, 1, 1]} : vector<4x32x16xbf16> to vector<1x32x16xbf16>
    %88 = vector.shape_cast %87 : vector<1x32x16xbf16> to vector<32x16xbf16>
    %cst_35 = arith.constant dense<0.000000e+00> : vector<8x16xf32>
    %89 = tpu.matmul %10, %88, %cst_35 {dimension_numbers = #tpu.dot_dimension_numbers<[1], [0], [0], [1], [0, 0, 1, 1], [], []>} : vector<8x32xbf16>, vector<32x16xbf16>, vector<8x16xf32> -> vector<8x16xf32>
    %90 = vector.extract_strided_slice %16 {offsets = [2, 0, 0], sizes = [1, 32, 16], strides = [1, 1, 1]} : vector<4x32x16xbf16> to vector<1x32x16xbf16>
    %91 = vector.shape_cast %90 : vector<1x32x16xbf16> to vector<32x16xbf16>
    %cst_36 = arith.constant dense<0.000000e+00> : vector<8x16xf32>
    %92 = tpu.matmul %10, %91, %cst_36 {dimension_numbers = #tpu.dot_dimension_numbers<[1], [0], [0], [1], [0, 0, 1, 1], [], []>} : vector<8x32xbf16>, vector<32x16xbf16>, vector<8x16xf32> -> vector<8x16xf32>
    %93 = arith.truncf %86 : vector<8x16xf32> to vector<8x16xbf16>
    %94 = arith.truncf %89 : vector<8x16xf32> to vector<8x16xbf16>
    %cst_37 = arith.constant dense<0.000000e+00> : vector<8x8xf32>
    %95 = tpu.matmul %93, %94, %cst_37 {dimension_numbers = #tpu.dot_dimension_numbers<[1], [1], [0], [0], [0, 0, 1, 0], [], []>} : vector<8x16xbf16>, vector<8x16xbf16>, vector<8x8xf32> -> vector<8x8xf32>
    %cst_38 = arith.constant dense<0xFF800000> : vector<8xf32>
    %96 = vector.multi_reduction <maximumf>, %95, %cst_38 [1] : vector<8x8xf32> to vector<8xf32>
    %97 = vector.shape_cast %96 : vector<8xf32> to vector<8x1xf32>
    %98 = vector.broadcast %97 : vector<8x1xf32> to vector<8x8xf32>
    %99 = arith.subf %95, %98 : vector<8x8xf32>
    %100 = math.exp %99 : vector<8x8xf32>
    %cst_39 = arith.constant dense<0.000000e+00> : vector<8xf32>
    %101 = vector.multi_reduction <add>, %100, %cst_39 [1] : vector<8x8xf32> to vector<8xf32>
    %102 = vector.shape_cast %101 : vector<8xf32> to vector<8x1xf32>
    %103 = tpu.reciprocal %102 {approx = true} : vector<8x1xf32> -> vector<8x1xf32>
    %104 = vector.broadcast %103 : vector<8x1xf32> to vector<8x8xf32>
    %105 = arith.mulf %100, %104 : vector<8x8xf32>
    %106 = arith.mulf %105, %8 : vector<8x8xf32>
    %107 = arith.truncf %106 : vector<8x8xf32> to vector<8x8xbf16>
    %108 = arith.truncf %92 : vector<8x16xf32> to vector<8x16xbf16>
    %cst_40 = arith.constant dense<0.000000e+00> : vector<8x16xf32>
    %109 = tpu.matmul %107, %108, %cst_40 {dimension_numbers = #tpu.dot_dimension_numbers<[1], [0], [0], [1], [0, 0, 1, 1], [], []>} : vector<8x8xbf16>, vector<8x16xbf16>, vector<8x16xf32> -> vector<8x16xf32>
    %110 = arith.truncf %109 : vector<8x16xf32> to vector<8x16xbf16>
    %111 = vector.extract_strided_slice %18 {offsets = [2, 0, 0], sizes = [1, 16, 32], strides = [1, 1, 1]} : vector<4x16x32xbf16> to vector<1x16x32xbf16>
    %112 = vector.shape_cast %111 : vector<1x16x32xbf16> to vector<16x32xbf16>
    %cst_41 = arith.constant dense<0.000000e+00> : vector<8x32xf32>
    %113 = tpu.matmul %110, %112, %cst_41 {dimension_numbers = #tpu.dot_dimension_numbers<[1], [0], [0], [1], [0, 0, 1, 1], [], []>} : vector<8x16xbf16>, vector<16x32xbf16>, vector<8x32xf32> -> vector<8x32xf32>
    %114 = arith.addf %83, %113 : vector<8x32xf32>
    %115 = vector.extract_strided_slice %12 {offsets = [3, 0, 0], sizes = [1, 32, 16], strides = [1, 1, 1]} : vector<4x32x16xbf16> to vector<1x32x16xbf16>
    %116 = vector.shape_cast %115 : vector<1x32x16xbf16> to vector<32x16xbf16>
    %cst_42 = arith.constant dense<0.000000e+00> : vector<8x16xf32>
    %117 = tpu.matmul %10, %116, %cst_42 {dimension_numbers = #tpu.dot_dimension_numbers<[1], [0], [0], [1], [0, 0, 1, 1], [], []>} : vector<8x32xbf16>, vector<32x16xbf16>, vector<8x16xf32> -> vector<8x16xf32>
    %118 = vector.extract_strided_slice %14 {offsets = [3, 0, 0], sizes = [1, 32, 16], strides = [1, 1, 1]} : vector<4x32x16xbf16> to vector<1x32x16xbf16>
    %119 = vector.shape_cast %118 : vector<1x32x16xbf16> to vector<32x16xbf16>
    %cst_43 = arith.constant dense<0.000000e+00> : vector<8x16xf32>
    %120 = tpu.matmul %10, %119, %cst_43 {dimension_numbers = #tpu.dot_dimension_numbers<[1], [0], [0], [1], [0, 0, 1, 1], [], []>} : vector<8x32xbf16>, vector<32x16xbf16>, vector<8x16xf32> -> vector<8x16xf32>
    %121 = vector.extract_strided_slice %16 {offsets = [3, 0, 0], sizes = [1, 32, 16], strides = [1, 1, 1]} : vector<4x32x16xbf16> to vector<1x32x16xbf16>
    %122 = vector.shape_cast %121 : vector<1x32x16xbf16> to vector<32x16xbf16>
    %cst_44 = arith.constant dense<0.000000e+00> : vector<8x16xf32>
    %123 = tpu.matmul %10, %122, %cst_44 {dimension_numbers = #tpu.dot_dimension_numbers<[1], [0], [0], [1], [0, 0, 1, 1], [], []>} : vector<8x32xbf16>, vector<32x16xbf16>, vector<8x16xf32> -> vector<8x16xf32>
    %124 = arith.truncf %117 : vector<8x16xf32> to vector<8x16xbf16>
    %125 = arith.truncf %120 : vector<8x16xf32> to vector<8x16xbf16>
    %cst_45 = arith.constant dense<0.000000e+00> : vector<8x8xf32>
    %126 = tpu.matmul %124, %125, %cst_45 {dimension_numbers = #tpu.dot_dimension_numbers<[1], [1], [0], [0], [0, 0, 1, 0], [], []>} : vector<8x16xbf16>, vector<8x16xbf16>, vector<8x8xf32> -> vector<8x8xf32>
    %cst_46 = arith.constant dense<0xFF800000> : vector<8xf32>
    %127 = vector.multi_reduction <maximumf>, %126, %cst_46 [1] : vector<8x8xf32> to vector<8xf32>
    %128 = vector.shape_cast %127 : vector<8xf32> to vector<8x1xf32>
    %129 = vector.broadcast %128 : vector<8x1xf32> to vector<8x8xf32>
    %130 = arith.subf %126, %129 : vector<8x8xf32>
    %131 = math.exp %130 : vector<8x8xf32>
    %cst_47 = arith.constant dense<0.000000e+00> : vector<8xf32>
    %132 = vector.multi_reduction <add>, %131, %cst_47 [1] : vector<8x8xf32> to vector<8xf32>
    %133 = vector.shape_cast %132 : vector<8xf32> to vector<8x1xf32>
    %134 = tpu.reciprocal %133 {approx = true} : vector<8x1xf32> -> vector<8x1xf32>
    %135 = vector.broadcast %134 : vector<8x1xf32> to vector<8x8xf32>
    %136 = arith.mulf %131, %135 : vector<8x8xf32>
    %137 = arith.mulf %136, %8 : vector<8x8xf32>
    %138 = arith.truncf %137 : vector<8x8xf32> to vector<8x8xbf16>
    %139 = arith.truncf %123 : vector<8x16xf32> to vector<8x16xbf16>
    %cst_48 = arith.constant dense<0.000000e+00> : vector<8x16xf32>
    %140 = tpu.matmul %138, %139, %cst_48 {dimension_numbers = #tpu.dot_dimension_numbers<[1], [0], [0], [1], [0, 0, 1, 1], [], []>} : vector<8x8xbf16>, vector<8x16xbf16>, vector<8x16xf32> -> vector<8x16xf32>
    %141 = arith.truncf %140 : vector<8x16xf32> to vector<8x16xbf16>
    %142 = vector.extract_strided_slice %18 {offsets = [3, 0, 0], sizes = [1, 16, 32], strides = [1, 1, 1]} : vector<4x16x32xbf16> to vector<1x16x32xbf16>
    %143 = vector.shape_cast %142 : vector<1x16x32xbf16> to vector<16x32xbf16>
    %cst_49 = arith.constant dense<0.000000e+00> : vector<8x32xf32>
    %144 = tpu.matmul %141, %143, %cst_49 {dimension_numbers = #tpu.dot_dimension_numbers<[1], [0], [0], [1], [0, 0, 1, 1], [], []>} : vector<8x16xbf16>, vector<16x32xbf16>, vector<8x32xf32> -> vector<8x32xf32>
    %145 = arith.addf %114, %144 : vector<8x32xf32>
    %c0_50 = arith.constant 0 : index
    %c0_51 = arith.constant 0 : index
    %146 = vector.load %arg8[%c0_50, %c0_51] : memref<8x32xf32, #tpu.memory_space<vmem>>, vector<8x32xf32>
    tpu.vector_store %arg8[%c0_50, %c0_51], %145 {strides = array<i32>} : memref<8x32xf32, #tpu.memory_space<vmem>>, vector<8x32xf32>,
    return
  }
}

</mosaic_0001>

<bundles_post_ra>
// kernel: tpu_custom_call.1
= control target key start
LH: loop header
LB: loop body
LE: loop exit
PB: predicated region body
PF: predicated region fallthrough
CT: control target
= control target key end

     0   :  { %v1564_v3 = vmov 0.0   ;;  %vm1565_vm0 = vmmov 0   ;;  %s1951_s0 = inlined_call_operand.vmem [shape: s32[8,1], index: 0, kind: input, shape index: {}]   ;;  %s1952_s1 = inlined_call_operand.vmem [shape: s32[1,8], index: 1, kind: input, shape index: {}]   ;;  %s1953_s2 = inlined_call_operand.vmem [shape: f32[8,32], index: 2, kind: input, shape index: {}]   ;;  %s1954_s3 = inlined_call_operand.vmem [shape: f32[4,32,16], index: 3, kind: input, shape index: {}]   ;;  %s1955_s4 = inlined_call_operand.vmem [shape: f32[4,32,16], index: 4, kind: input, shape index: {}]   ;;  %s1956_s5 = inlined_call_operand.vmem [shape: f32[4,32,16], index: 5, kind: input, shape index: {}]   ;;  %s1957_s6 = inlined_call_operand.vmem [shape: f32[4,16,32], index: 6, kind: input, shape index: {}]   ;;  %s1958_s7 = inlined_call_operand.vmem [shape: f32[1,32], index: 7, kind: input, shape index: {}]   ;;  %s1959_s8 = inlined_call_operand.hbm [shape: f32[8,32], index: 8, kind: output, shape index: {}]  }
   0x1   :  { %v69_v0 = vld [vmem:[%s1955_s4] sm:$0xff]  ;;  %v70_v1 = vld [vmem:[%s1955_s4 + $0x8] sm:$0xff]  ;;  %v71_v2 = vld [vmem:[%s1955_s4 + $0x10] sm:$0xff]  ;;  %1345 = vmatprep.subr.bf16.mxu1 %v1564_v3  ;;  %1337 = vmatprep.subr.bf16.mxu0 %v1564_v3 }
   0x2   :  { %v85_v4 = vpack.c.bf16 %v70_v1, %v69_v0  ;;  %v72_v5 = vld [vmem:[%s1955_s4 + $0x18] sm:$0xff]  ;;  %v45_v6 = vld [vmem:[%s1954_s3] sm:$0xff]  ;;  %v46_v7 = vld [vmem:[%s1954_s3 + $0x8] sm:$0xff]  ;;  %1349 = vmatprep.mubr.msk.bf16.mxu1 %vm1565_vm0, %v1564_v3  ;;  %1341 = vmatprep.mubr.msk.bf16.mxu0 %vm1565_vm0, %v1564_v3 }
   0x3   :  { %v61_v8 = vpack.c.bf16 %v46_v7, %v45_v6  ;;  %v47_v9 = vld [vmem:[%s1954_s3 + $0x10] sm:$0xff]  ;;  %v48_v10 = vld [vmem:[%s1954_s3 + $0x18] sm:$0xff]  ;;  %v86_v11 = vpack.c.bf16 %v72_v5, %v71_v2  ;;  %v43_v12 = vld [vmem:[%s1953_s2] sm:$0xff] }
   0x4   :  { %1346 = vmatpush3.bf16.msra.mxu1 %v85_v4 }
   0x5   :  { %13 = vsyncpa [#allocation3], 0  ;;  %1347 = vmatprep.subr.bf16.mxu1 %v1564_v3  ;;  %1338 = vmatpush3.bf16.msra.mxu0 %v61_v8  ;;  %v62_v13 = vpack.c.bf16 %v48_v10, %v47_v9  ;;  %v1648_v14 = vpack.c.bf16 %v43_v12, %v43_v12  ;;  %vm136_vm1 = vcmask 261120   ;;  %vm262_vm2 = vcmask 130048   ;;  %v93_v26 = vld [vmem:[%s1956_s5] sm:$0xff]  ;;  %v94_v27 = vld [vmem:[%s1956_s5 + $0x8] sm:$0xff] }
   0x6   :  { %1339 = vmatprep.subr.bf16.mxu0 %v1564_v3  ;;  %v95_v28 = vld [vmem:[%s1956_s5 + $0x10] sm:$0xff]  ;;  %v109_v29 = vpack.c.bf16 %v94_v27, %v93_v26  ;;  %v96_v30 = vld [vmem:[%s1956_s5 + $0x18] sm:$0xff]  ;;  %vm309_vm3 = vcmask 64512   ;;  %v31_v37 = vld [vmem:[%s1951_s0] sm:$0xff]  ;;  %v1566_v38 = vmov 0   ;;  %vm327_vm4 = vcmask 1043456  }
   0x7   :  { %v110_v31 = vpack.c.bf16 %v96_v30, %v95_v28  ;;  %1522 = vset.pattern.permute.xlu1 %v1566_v38  ;;  %1523 = vset.pattern.permute.xlu0 %v1566_v38  ;;  %v117_v50 = vld [vmem:[%s1957_s6] sm:$0xff]  ;;  %v118_v51 = vld [vmem:[%s1957_s6 + $0x8] sm:$0xff]  ;;  %v51_v0 = vld [vmem:[%s1954_s3 + $0x30] sm:$0xff]  ;;  %s1567_s21 = smov [#allocation2]  }
   0x8   :  { %1348 = vmatpush3.bf16.msra.mxu1 %v86_v11  ;;  %33 = vperm.xlu1 %1522, %v31_v37   ;;  %v125_v52 = vpack.c.bf16 %v118_v51, %v117_v50  ;;  %v1250_v54 = vld [vmem:[%s1952_s1] ss:$0 sm:$0xff]  ;;  %v50_v62 = vld [vmem:[%s1954_s3 + $0x28] sm:$0xff]  ;;  %v52_v1 = vld [vmem:[%s1954_s3 + $0x38] sm:$0xff]  ;;  %s1242_s22 = sshll.u32 %s1567_s21, 4  ;;  %s1243_s22 = int_to_ptr.vmem [resolvable:$true] %s1242_s22 }
   0x9   :  { %1340 = vmatpush3.bf16.msra.mxu0 %v62_v13  ;;  %1361 = vmatprep.subr.bf16.mxu1 %v1564_v3  ;;  %v49_v61 = vld [vmem:[%s1954_s3 + $0x20] sm:$0xff]  ;;  %v64_v2 = vpack.c.bf16 %v52_v1, %v51_v0  ;;  %v74_v5 = vld [vmem:[%s1955_s4 + $0x28] sm:$0xff]  ;;  %v75_v10 = vld [vmem:[%s1955_s4 + $0x30] sm:$0xff]  ;;  %s1540_s2 = scalar_lea.vmem %s1243_s22, 128  ;;  %p1545_p1 = scmp.lt.s32.totalorder %s1243_s22, %s1243_s22 }
   0xa   :  { %1353 = vmatprep.subr.bf16.mxu0 %v1564_v3  ;;  %v63_v63 = vpack.c.bf16 %v50_v62, %v49_v61  ;;  %v73_v4 = vld [vmem:[%s1955_s4 + $0x20] sm:$0xff]  ;;  %v76_v11 = vld [vmem:[%s1955_s4 + $0x38] sm:$0xff]  ;;  %v98_v28 = vld [vmem:[%s1956_s5 + $0x28] sm:$0xff]  ;;  %p1541_p0 = scmp.ne.s32.totalorder %s1243_s22, %s1540_s2  ;;  %p1546_p2 = scmp.lt.s32.totalorder %s1540_s2, %s1540_s2 }
   0xb   :  { %1350 = vmatmul.mubr.msk.bf16.vlgmr.msra.gmra.mrb[0].mxu1 %vm136_vm1, %v1648_v14  ;;  %v87_v7 = vpack.c.bf16 %v74_v5, %v73_v4  ;;  %v97_v27 = vld [vmem:[%s1956_s5 + $0x20] sm:$0xff]  ;;  %v120_v50 = vld [vmem:[%s1957_s6 + $0x18] sm:$0xff]  ;;  %v55_v61 = vld [vmem:[%s1954_s3 + $0x50] sm:$0xff] }
   0xc   :  { %1342 = vmatmul.mubr.msk.bf16.vlgmr.msra.gmra.mrb[0].mxu0 %vm136_vm1, %v1648_v14  ;;  %1363 = vmatprep.mubr.msk.bf16.mxu1 %vm1565_vm0, %v1564_v3  ;;  %v111_v30 = vpack.c.bf16 %v98_v28, %v97_v27  ;;  %v56_v62 = vld [vmem:[%s1954_s3 + $0x58] sm:$0xff]  ;;  %v77_v0 = vld [vmem:[%s1955_s4 + $0x40] sm:$0xff]  ;;  %v78_v1 = vld [vmem:[%s1955_s4 + $0x48] sm:$0xff]  ;;  %p1547_p3 = por %p1546_p2, %p1545_p1 }
   0xd   :  { %1357 = vmatprep.mubr.msk.bf16.mxu0 %vm1565_vm0, %v1564_v3  ;;  %1354 = vmatpush3.bf16.msra.mxu0 %v109_v29  ;;  %v99_v29 = vld [vmem:[%s1956_s5 + $0x30] sm:$0xff]  ;;  %v89_v4 = vpack.c.bf16 %v78_v1, %v77_v0  ;;  %v104_v28 = vld [vmem:[%s1956_s5 + $0x58] sm:$0xff] }
   0xe   :  { %1355 = vmatprep.subr.bf16.mxu0 %v1564_v3  ;;  %p1548_p4 = pnand %p1547_p3, %p1541_p0 }
  0x11   :  { %1356 = vmatpush3.bf16.msra.mxu0 %v110_v31  ;;  %v100_v31 = vld [vmem:[%s1956_s5 + $0x38] sm:$0xff] }
  0x12   :  { %1367 = vmatprep.subr.bf16.mxu0 %v1564_v3 }
  0x14   :  { %1358 = vmatmul.mubr.msk.bf16.vlgmr.msra.gmra.mrb[4].mxu0 %vm136_vm1, %v1648_v14 }
  0x15   :  { %1369 = vmatprep.mubr.msk.bf16.mxu0 %vm1565_vm0, %v1564_v3 }
  0x87   :  { %v34_v55 = vpop.permute.xlu1 %33 }
  0x88   :  { %vm40_vm5 = vcmp.eq.s32.totalorder %v34_v55, %v1250_v54 }
  0x89   :  { %v1701_v57 = vsel %vm40_vm5, 1.0, %v1564_v3 }
  0xde   :  { %v214_v15 = vpop.f32.mrb[0].mxu1 }
  0xdf   :  { %v261_v16 = vpack.c.bf16 %v214_v15, %v214_v15  ;;  %v1351_v17 = vpop.f32.mrb[1].mxu1  ;;  %v174_v18 = vpop.f32.mrb[0].mxu0  ;;  %v88_v15 = vpack.c.bf16 %v76_v11, %v75_v10 }
  0xe0   :  { %v217_v19 = vpop.f32.mrb[2].mxu1  ;;  %v1343_v20 = vpop.f32.mrb[1].mxu0  ;;  %v260_v25 = vpack.c.bf16 %v174_v18, %v174_v18 }
  0xe1   :  { %v267_v21 = vsel %vm262_vm2, %v261_v16, 0  ;;  %v1352_v22 = vpop.f32.mrb[3].mxu1  ;;  %v177_v23 = vpop.f32.mrb[2].mxu0 }
  0xe2   :  { %1362 = vmatpush3.bf16.xpose.msra.mxu1 %v267_v21  ;;  %v1344_v24 = vpop.f32.mrb[3].mxu0 }
  0xe3   :  { %1373 = vmatprep.subr.bf16.mxu1 %v1564_v3 }
  0xe7   :  { %v254_v44 = vpop.f32.mrb[4].mxu0 }
  0xe8   :  { %v323_v45 = vpack.c.bf16 %v254_v44, %v254_v44  ;;  %v1359_v46 = vpop.f32.mrb[5].mxu0 }
  0xe9   :  { %1364 = vmatmul.mubr.msk.bf16.vlgmr.msra.gmra.mrb[4].mxu1 %vm262_vm2, %v260_v25  ;;  %v257_v47 = vpop.f32.mrb[6].mxu0 }
  0xea   :  { %1375 = vmatprep.mubr.msk.bf16.mxu1 %vm1565_vm0, %v1564_v3  ;;  %v329_v48 = vsel %vm327_vm4, %v323_v45, 0  ;;  %v1360_v49 = vpop.f32.mrb[7].mxu0  ;;  %1374 = vmatpush3.bf16.msra.mxu1 %v125_v52 }
  0xeb   :  { %1368 = vmatpush3.bf16.msra.mxu0 %v329_v48  ;;  %1387 = vmatprep.subr.bf16.mxu1 %v1564_v3  ;;  %v119_v49 = vld [vmem:[%s1957_s6 + $0x10] sm:$0xff] }
  0xec   :  { %1379 = vmatprep.subr.bf16.mxu0 %v1564_v3  ;;  %v126_v51 = vpack.c.bf16 %v120_v50, %v119_v49 }
 0x1bc   :  { %v303_v32 = vpop.f32.mrb[4].mxu1 }
 0x1bd   :  { %v1365_v33 = vpop.f32.mrb[5].mxu1  ;;  %v310_v34 = vsel %vm309_vm3, %v303_v32, -inf }
 0x1be   :  { %311 = vmax.xlane.f32.xlu0 %v310_v34  ;;  %v306_v35 = vpop.f32.mrb[6].mxu1 }
 0x1bf   :  { %v1366_v36 = vpop.f32.mrb[7].mxu1 }
 0x24b   :  { %v312_v39 = vpop.xlane.xlu0 %311 }
 0x24c   :  { %v313_v40 = vsub.f32 %v303_v32, %v312_v39  ;;  %v112_v32 = vpack.c.bf16 %v100_v31, %v99_v29 }
 0x24e   :  { %v314_v41 = vmul.f32 1.442695, %v313_v40 }
 0x250   :  { %1524 = vpow2.f32 %v314_v41 }
 0x25a   :  { %v1525_v42 = vpop.eup %1524 }
 0x25b   :  { %v316_v43 = vsel %vm309_vm3, %v1525_v42, 0.0 }
 0x25c   :  { %317 = vadd.xlane.f32.xlu0 %v316_v43 }
 0x2e9   :  { %v318_v53 = vpop.xlane.xlu0 %317 }
 0x2ea   :  { %1526 = vrcp.f32 %v318_v53 }
 0x2f4   :  { %v1527_v56 = vpop.eup %1526 }
 0x2f5   :  { %v320_v58 = vmul.f32 %v1527_v56, %v1525_v42 }
 0x2f7   :  { %v321_v59 = vmul.f32 %v1701_v57, %v320_v58  ;;  %v53_v58 = vld [vmem:[%s1954_s3 + $0x40] sm:$0xff] }
 0x2f9   :  { %v322_v60 = vpack.c.bf16 %v321_v59, %v321_v59  ;;  %v54_v59 = vld [vmem:[%s1954_s3 + $0x48] sm:$0xff] }
 0x2fb   :  { %1370 = vmatmul.mubr.msk.bf16.vlgmr.msra.gmra.mrb[8].mxu0 %vm309_vm3, %v322_v60  ;;  %v65_v60 = vpack.c.bf16 %v54_v59, %v53_v58  ;;  %v59_v58 = vld [vmem:[%s1954_s3 + $0x70] sm:$0xff]  ;;  %v60_v59 = vld [vmem:[%s1954_s3 + $0x78] sm:$0xff] }
 0x2fc   :  { %1383 = vmatprep.mubr.msk.bf16.mxu0 %vm1565_vm0, %v1564_v3  ;;  %1380 = vmatpush3.bf16.msra.mxu0 %v63_v63  ;;  %v66_v63 = vpack.c.bf16 %v56_v62, %v55_v61  ;;  %v81_v61 = vld [vmem:[%s1955_s4 + $0x60] sm:$0xff]  ;;  %v82_v62 = vld [vmem:[%s1955_s4 + $0x68] sm:$0xff] }
 0x2fd   :  { %1381 = vmatprep.subr.bf16.mxu0 %v1564_v3  ;;  %v91_v0 = vpack.c.bf16 %v82_v62, %v81_v61 }
 0x300   :  { %1382 = vmatpush3.bf16.msra.mxu0 %v64_v2 }
 0x301   :  { %1395 = vmatprep.subr.bf16.mxu0 %v1564_v3 }
 0x303   :  { %1384 = vmatmul.mubr.msk.bf16.vlgmr.msra.gmra.mrb[12].mxu0 %vm136_vm1, %v1648_v14 }
 0x304   :  { %1399 = vmatprep.mubr.msk.bf16.mxu0 %vm1565_vm0, %v1564_v3  ;;  %1396 = vmatpush3.bf16.msra.mxu0 %v111_v30 }
 0x305   :  { %1397 = vmatprep.subr.bf16.mxu0 %v1564_v3 }
 0x308   :  { %1398 = vmatpush3.bf16.msra.mxu0 %v112_v32 }
 0x309   :  { %1409 = vmatprep.subr.bf16.mxu0 %v1564_v3 }
 0x30b   :  { %1400 = vmatmul.mubr.msk.bf16.vlgmr.msra.gmra.mrb[16].mxu0 %vm136_vm1, %v1648_v14 }
 0x30c   :  { %1411 = vmatprep.mubr.msk.bf16.mxu0 %vm1565_vm0, %v1564_v3 }
 0x3ce   :  { %v365_v6 = vpop.f32.mrb[8].mxu0 }
 0x3cf   :  { %v371_v8 = vpack.c.bf16 %v365_v6, %v365_v6  ;;  %v1371_v9 = vpop.f32.mrb[9].mxu0 }
 0x3d0   :  { %v368_v12 = vpop.f32.mrb[10].mxu0 }
 0x3d1   :  { %v1372_v13 = vpop.f32.mrb[11].mxu0  ;;  %1376 = vmatmul.mubr.msk.bf16.vlgmr.msra.gmra.mrb[8].mxu1 %vm262_vm2, %v371_v8  ;;  %v80_v8 = vld [vmem:[%s1955_s4 + $0x58] sm:$0xff] }
 0x3d2   :  { %1388 = vmatpush3.bf16.msra.mxu1 %v87_v7  ;;  %1391 = vmatprep.mubr.msk.bf16.mxu1 %vm1565_vm0, %v1564_v3  ;;  %v79_v7 = vld [vmem:[%s1955_s4 + $0x50] sm:$0xff] }
 0x3d3   :  { %1389 = vmatprep.subr.bf16.mxu1 %v1564_v3  ;;  %v90_v11 = vpack.c.bf16 %v80_v8, %v79_v7 }
 0x3d6   :  { %1390 = vmatpush3.bf16.msra.mxu1 %v88_v15  ;;  %v450_v16 = vpop.f32.mrb[12].mxu0 }
 0x3d7   :  { %1403 = vmatprep.subr.bf16.mxu1 %v1564_v3  ;;  %v1385_v17 = vpop.f32.mrb[13].mxu0  ;;  %v536_v26 = vpack.c.bf16 %v450_v16, %v450_v16 }
 0x3d8   :  { %v453_v18 = vpop.f32.mrb[14].mxu0 }
 0x3d9   :  { %1392 = vmatmul.mubr.msk.bf16.vlgmr.msra.gmra.mrb[12].mxu1 %vm136_vm1, %v1648_v14  ;;  %v1386_v19 = vpop.f32.mrb[15].mxu0 }
 0x3da   :  { %1405 = vmatprep.mubr.msk.bf16.mxu1 %vm1565_vm0, %v1564_v3 }
 0x3de   :  { %v530_v43 = vpop.f32.mrb[16].mxu0 }
 0x3df   :  { %v1401_v44 = vpop.f32.mrb[17].mxu0  ;;  %v597_v47 = vpack.c.bf16 %v530_v43, %v530_v43 }
 0x3e0   :  { %v533_v45 = vpop.f32.mrb[18].mxu0 }
 0x3e1   :  { %v1402_v46 = vpop.f32.mrb[19].mxu0  ;;  %v602_v48 = vsel %vm327_vm4, %v597_v47, 0  ;;  %v122_v47 = vld [vmem:[%s1957_s6 + $0x28] sm:$0xff] }
 0x3e2   :  { %1410 = vmatpush3.bf16.msra.mxu0 %v602_v48  ;;  %v121_v46 = vld [vmem:[%s1957_s6 + $0x20] sm:$0xff] }
 0x3e3   :  { %1421 = vmatprep.subr.bf16.mxu0 %v1564_v3  ;;  %v127_v48 = vpack.c.bf16 %v122_v47, %v121_v46 }
 0x4ac   :  { %v490_v20 = vpop.f32.mrb[12].mxu1 }
 0x4ad   :  { %v537_v21 = vpack.c.bf16 %v490_v20, %v490_v20  ;;  %v1393_v22 = vpop.f32.mrb[13].mxu1 }
 0x4ae   :  { %v493_v23 = vpop.f32.mrb[14].mxu1 }
 0x4af   :  { %v542_v24 = vsel %vm262_vm2, %v537_v21, 0  ;;  %v1394_v25 = vpop.f32.mrb[15].mxu1 }
 0x4b0   :  { %1404 = vmatpush3.bf16.xpose.msra.mxu1 %v542_v24  ;;  %v101_v24 = vld [vmem:[%s1956_s5 + $0x40] sm:$0xff]  ;;  %v102_v25 = vld [vmem:[%s1956_s5 + $0x48] sm:$0xff] }
 0x4b1   :  { %1415 = vmatprep.subr.bf16.mxu1 %v1564_v3  ;;  %v113_v27 = vpack.c.bf16 %v102_v25, %v101_v24  ;;  %v108_v25 = vld [vmem:[%s1956_s5 + $0x78] sm:$0xff] }
 0x4b7   :  { %1406 = vmatmul.mubr.msk.bf16.vlgmr.msra.gmra.mrb[16].mxu1 %vm262_vm2, %v536_v26  ;;  %v103_v26 = vld [vmem:[%s1956_s5 + $0x50] sm:$0xff] }
 0x4b8   :  { %1417 = vmatprep.mubr.msk.bf16.mxu1 %vm1565_vm0, %v1564_v3  ;;  %1416 = vmatpush3.bf16.msra.mxu1 %v126_v51  ;;  %v114_v29 = vpack.c.bf16 %v104_v28, %v103_v26 }
 0x4b9   :  { %1429 = vmatprep.subr.bf16.mxu1 %v1564_v3 }
 0x58a   :  { %v578_v33 = vpop.f32.mrb[16].mxu1 }
 0x58b   :  { %v1407_v34 = vpop.f32.mrb[17].mxu1  ;;  %v584_v35 = vsel %vm309_vm3, %v578_v33, -inf }
 0x58c   :  { %585 = vmax.xlane.f32.xlu1 %v584_v35  ;;  %v581_v36 = vpop.f32.mrb[18].mxu1 }
 0x58d   :  { %v1408_v37 = vpop.f32.mrb[19].mxu1 }
 0x619   :  { %v586_v38 = vpop.xlane.xlu1 %585 }
 0x61a   :  { %v587_v39 = vsub.f32 %v578_v33, %v586_v38 }
 0x61c   :  { %v588_v40 = vmul.f32 1.442695, %v587_v39 }
 0x61e   :  { %1528 = vpow2.f32 %v588_v40 }
 0x628   :  { %v1529_v41 = vpop.eup %1528 }
 0x629   :  { %v590_v42 = vsel %vm309_vm3, %v1529_v41, 0.0 }
 0x62a   :  { %591 = vadd.xlane.f32.xlu0 %v590_v42 }
 0x6b7   :  { %v592_v52 = vpop.xlane.xlu0 %591 }
 0x6b8   :  { %1530 = vrcp.f32 %v592_v52 }
 0x6c2   :  { %v1531_v53 = vpop.eup %1530 }
 0x6c3   :  { %v594_v54 = vmul.f32 %v1531_v53, %v1529_v41 }
 0x6c5   :  { %v595_v55 = vmul.f32 %v1701_v57, %v594_v54  ;;  %v57_v54 = vld [vmem:[%s1954_s3 + $0x60] sm:$0xff] }
 0x6c7   :  { %v596_v56 = vpack.c.bf16 %v595_v55, %v595_v55  ;;  %v58_v55 = vld [vmem:[%s1954_s3 + $0x68] sm:$0xff] }
 0x6c9   :  { %1412 = vmatmul.mubr.msk.bf16.vlgmr.msra.gmra.mrb[20].mxu0 %vm309_vm3, %v596_v56  ;;  %v67_v56 = vpack.c.bf16 %v58_v55, %v57_v54  ;;  %v1252_v54 = vld [vmem:[%s1958_s7] ss:$0 sm:$0xff] }
 0x6ca   :  { %1425 = vmatprep.mubr.msk.bf16.mxu0 %vm1565_vm0, %v1564_v3  ;;  %1422 = vmatpush3.bf16.msra.mxu0 %v65_v60  ;;  %v68_v60 = vpack.c.bf16 %v60_v59, %v59_v58 }
 0x6cb   :  { %1423 = vmatprep.subr.bf16.mxu0 %v1564_v3 }
 0x6ce   :  { %1424 = vmatpush3.bf16.msra.mxu0 %v66_v63 }
 0x6cf   :  { %1437 = vmatprep.subr.bf16.mxu0 %v1564_v3 }
 0x6d1   :  { %1426 = vmatmul.mubr.msk.bf16.vlgmr.msra.gmra.mrb[24].mxu0 %vm136_vm1, %v1648_v14 }
 0x6d2   :  { %1441 = vmatprep.mubr.msk.bf16.mxu0 %vm1565_vm0, %v1564_v3  ;;  %1438 = vmatpush3.bf16.msra.mxu0 %v113_v27 }
 0x6d3   :  { %1439 = vmatprep.subr.bf16.mxu0 %v1564_v3 }
 0x6d6   :  { %1440 = vmatpush3.bf16.msra.mxu0 %v114_v29 }
 0x6d7   :  { %1451 = vmatprep.subr.bf16.mxu0 %v1564_v3 }
 0x6d9   :  { %1442 = vmatmul.mubr.msk.bf16.vlgmr.msra.gmra.mrb[28].mxu0 %vm136_vm1, %v1648_v14 }
 0x6da   :  { %1453 = vmatprep.mubr.msk.bf16.mxu0 %vm1565_vm0, %v1564_v3 }
 0x79c   :  { %v638_v2 = vpop.f32.mrb[20].mxu0 }
 0x79d   :  { %v644_v5 = vpack.c.bf16 %v638_v2, %v638_v2  ;;  %v1413_v6 = vpop.f32.mrb[21].mxu0 }
 0x79e   :  { %v641_v9 = vpop.f32.mrb[22].mxu0 }
 0x79f   :  { %v1414_v10 = vpop.f32.mrb[23].mxu0  ;;  %1418 = vmatmul.mubr.msk.bf16.vlgmr.msra.gmra.mrb[8].mxu1 %vm262_vm2, %v644_v5  ;;  %v84_v5 = vld [vmem:[%s1955_s4 + $0x78] sm:$0xff] }
 0x7a0   :  { %1430 = vmatpush3.bf16.msra.mxu1 %v89_v4  ;;  %1433 = vmatprep.mubr.msk.bf16.mxu1 %vm1565_vm0, %v1564_v3  ;;  %v83_v4 = vld [vmem:[%s1955_s4 + $0x70] sm:$0xff] }
 0x7a1   :  { %1431 = vmatprep.subr.bf16.mxu1 %v1564_v3  ;;  %v92_v8 = vpack.c.bf16 %v84_v5, %v83_v4 }
 0x7a4   :  { %1432 = vmatpush3.bf16.msra.mxu1 %v90_v11  ;;  %v723_v12 = vpop.f32.mrb[24].mxu0 }
 0x7a5   :  { %1445 = vmatprep.subr.bf16.mxu1 %v1564_v3  ;;  %v1427_v13 = vpop.f32.mrb[25].mxu0  ;;  %v809_v23 = vpack.c.bf16 %v723_v12, %v723_v12 }
 0x7a6   :  { %v726_v15 = vpop.f32.mrb[26].mxu0 }
 0x7a7   :  { %1434 = vmatmul.mubr.msk.bf16.vlgmr.msra.gmra.mrb[20].mxu1 %vm136_vm1, %v1648_v14  ;;  %v1428_v16 = vpop.f32.mrb[27].mxu0 }
 0x7a8   :  { %1447 = vmatprep.mubr.msk.bf16.mxu1 %vm1565_vm0, %v1564_v3 }
 0x7ac   :  { %v803_v40 = vpop.f32.mrb[28].mxu0 }
 0x7ad   :  { %v1443_v41 = vpop.f32.mrb[29].mxu0  ;;  %v870_v44 = vpack.c.bf16 %v803_v40, %v803_v40 }
 0x7ae   :  { %v806_v42 = vpop.f32.mrb[30].mxu0  ;;  %v123_v41 = vld [vmem:[%s1957_s6 + $0x30] sm:$0xff] }
 0x7af   :  { %v1444_v43 = vpop.f32.mrb[31].mxu0  ;;  %v875_v45 = vsel %vm327_vm4, %v870_v44, 0  ;;  %v124_v42 = vld [vmem:[%s1957_s6 + $0x38] sm:$0xff] }
 0x7b0   :  { %1452 = vmatpush3.bf16.msra.mxu0 %v875_v45  ;;  %v128_v43 = vpack.c.bf16 %v124_v42, %v123_v41 }
 0x7b1   :  { %1463 = vmatprep.subr.bf16.mxu0 %v1564_v3 }
 0x87a   :  { %v763_v17 = vpop.f32.mrb[20].mxu1 }
 0x87b   :  { %v810_v18 = vpack.c.bf16 %v763_v17, %v763_v17  ;;  %v1435_v19 = vpop.f32.mrb[21].mxu1 }
 0x87c   :  { %v766_v20 = vpop.f32.mrb[22].mxu1 }
 0x87d   :  { %v815_v21 = vsel %vm262_vm2, %v810_v18, 0  ;;  %v1436_v22 = vpop.f32.mrb[23].mxu1 }
 0x87e   :  { %1446 = vmatpush3.bf16.xpose.msra.mxu1 %v815_v21  ;;  %v105_v21 = vld [vmem:[%s1956_s5 + $0x60] sm:$0xff]  ;;  %v106_v22 = vld [vmem:[%s1956_s5 + $0x68] sm:$0xff] }
 0x87f   :  { %1457 = vmatprep.subr.bf16.mxu1 %v1564_v3  ;;  %v115_v24 = vpack.c.bf16 %v106_v22, %v105_v21 }
 0x885   :  { %1448 = vmatmul.mubr.msk.bf16.vlgmr.msra.gmra.mrb[24].mxu1 %vm262_vm2, %v809_v23  ;;  %v107_v23 = vld [vmem:[%s1956_s5 + $0x70] sm:$0xff] }
 0x886   :  { %1459 = vmatprep.mubr.msk.bf16.mxu1 %vm1565_vm0, %v1564_v3  ;;  %1458 = vmatpush3.bf16.msra.mxu1 %v127_v48  ;;  %v116_v26 = vpack.c.bf16 %v108_v25, %v107_v23 }
 0x887   :  { %1471 = vmatprep.subr.bf16.mxu1 %v1564_v3 }
 0x958   :  { %v851_v30 = vpop.f32.mrb[24].mxu1 }
 0x959   :  { %v1449_v31 = vpop.f32.mrb[25].mxu1  ;;  %v857_v32 = vsel %vm309_vm3, %v851_v30, -inf }
 0x95a   :  { %858 = vmax.xlane.f32.xlu0 %v857_v32  ;;  %v854_v33 = vpop.f32.mrb[26].mxu1 }
 0x95b   :  { %v1450_v34 = vpop.f32.mrb[27].mxu1 }
 0x9e7   :  { %v859_v35 = vpop.xlane.xlu0 %858 }
 0x9e8   :  { %v860_v36 = vsub.f32 %v851_v30, %v859_v35 }
 0x9ea   :  { %v861_v37 = vmul.f32 1.442695, %v860_v36 }
 0x9ec   :  { %1532 = vpow2.f32 %v861_v37 }
 0x9f6   :  { %v1533_v38 = vpop.eup %1532 }
 0x9f7   :  { %v863_v39 = vsel %vm309_vm3, %v1533_v38, 0.0 }
 0x9f8   :  { %864 = vadd.xlane.f32.xlu0 %v863_v39 }
 0xa85   :  { %v865_v49 = vpop.xlane.xlu0 %864 }
 0xa86   :  { %1534 = vrcp.f32 %v865_v49 }
 0xa90   :  { %v1535_v50 = vpop.eup %1534 }
 0xa91   :  { %v867_v51 = vmul.f32 %v1535_v50, %v1533_v38 }
 0xa93   :  { %v868_v52 = vmul.f32 %v1701_v57, %v867_v51 }
 0xa95   :  { %v869_v53 = vpack.c.bf16 %v868_v52, %v868_v52 }
 0xa97   :  { %1454 = vmatmul.mubr.msk.bf16.vlgmr.msra.gmra.mrb[32].mxu0 %vm309_vm3, %v869_v53 }
 0xa98   :  { %1467 = vmatprep.mubr.msk.bf16.mxu0 %vm1565_vm0, %v1564_v3  ;;  %1464 = vmatpush3.bf16.msra.mxu0 %v67_v56 }
 0xa99   :  { %1465 = vmatprep.subr.bf16.mxu0 %v1564_v3 }
 0xa9c   :  { %1466 = vmatpush3.bf16.msra.mxu0 %v68_v60 }
 0xa9d   :  { %1479 = vmatprep.subr.bf16.mxu0 %v1564_v3 }
 0xa9f   :  { %1468 = vmatmul.mubr.msk.bf16.vlgmr.msra.gmra.mrb[36].mxu0 %vm136_vm1, %v1648_v14 }
 0xaa0   :  { %1483 = vmatprep.mubr.msk.bf16.mxu0 %vm1565_vm0, %v1564_v3  ;;  %1480 = vmatpush3.bf16.msra.mxu0 %v115_v24 }
 0xaa1   :  { %1481 = vmatprep.subr.bf16.mxu0 %v1564_v3 }
 0xaa4   :  { %1482 = vmatpush3.bf16.msra.mxu0 %v116_v26 }
 0xaa5   :  { %1493 = vmatprep.subr.bf16.mxu0 %v1564_v3 }
 0xaa7   :  { %1484 = vmatmul.mubr.msk.bf16.vlgmr.msra.gmra.mrb[40].mxu0 %vm136_vm1, %v1648_v14 }
 0xaa8   :  { %1495 = vmatprep.mubr.msk.bf16.mxu0 %vm1565_vm0, %v1564_v3 }
 0xb6a   :  { %v911_v63 = vpop.f32.mrb[32].mxu0 }
 0xb6b   :  { %v917_v1 = vpack.c.bf16 %v911_v63, %v911_v63  ;;  %v1455_v2 = vpop.f32.mrb[33].mxu0 }
 0xb6c   :  { %v914_v6 = vpop.f32.mrb[34].mxu0 }
 0xb6d   :  { %v1456_v7 = vpop.f32.mrb[35].mxu0  ;;  %1460 = vmatmul.mubr.msk.bf16.vlgmr.msra.gmra.mrb[8].mxu1 %vm262_vm2, %v917_v1 }
 0xb6e   :  { %1472 = vmatpush3.bf16.msra.mxu1 %v91_v0  ;;  %1475 = vmatprep.mubr.msk.bf16.mxu1 %vm1565_vm0, %v1564_v3 }
 0xb6f   :  { %1473 = vmatprep.subr.bf16.mxu1 %v1564_v3 }
 0xb72   :  { %1474 = vmatpush3.bf16.msra.mxu1 %v92_v8  ;;  %v996_v9 = vpop.f32.mrb[36].mxu0 }
 0xb73   :  { %1487 = vmatprep.subr.bf16.mxu1 %v1564_v3  ;;  %v1469_v10 = vpop.f32.mrb[37].mxu0  ;;  %v1082_v20 = vpack.c.bf16 %v996_v9, %v996_v9 }
 0xb74   :  { %v999_v11 = vpop.f32.mrb[38].mxu0 }
 0xb75   :  { %1476 = vmatmul.mubr.msk.bf16.vlgmr.msra.gmra.mrb[28].mxu1 %vm136_vm1, %v1648_v14  ;;  %v1470_v12 = vpop.f32.mrb[39].mxu0 }
 0xb76   :  { %1489 = vmatprep.mubr.msk.bf16.mxu1 %vm1565_vm0, %v1564_v3 }
 0xb7a   :  { %v1076_v37 = vpop.f32.mrb[40].mxu0 }
 0xb7b   :  { %v1485_v14 = vpop.f32.mrb[41].mxu0 }
 0xb7c   :  { %v1079_v38 = vpop.f32.mrb[42].mxu0 }
 0xb7d   :  { %v1486_v39 = vpop.f32.mrb[43].mxu0 }
 0xc48   :  { %v1036_v13 = vpop.f32.mrb[28].mxu1 }
 0xc49   :  { %v1083_v15 = vpack.c.bf16 %v1036_v13, %v1036_v13  ;;  %v1477_v16 = vpop.f32.mrb[29].mxu1 }
 0xc4a   :  { %v1039_v17 = vpop.f32.mrb[30].mxu1 }
 0xc4b   :  { %v1088_v18 = vsel %vm262_vm2, %v1083_v15, 0  ;;  %v1478_v19 = vpop.f32.mrb[31].mxu1 }
 0xc4c   :  { %1488 = vmatpush3.bf16.xpose.msra.mxu1 %v1088_v18 }
 0xc4d   :  { %1499 = vmatprep.subr.bf16.mxu1 %v1564_v3 }
 0xc53   :  { %1490 = vmatmul.mubr.msk.bf16.vlgmr.msra.gmra.mrb[32].mxu1 %vm262_vm2, %v1082_v20 }
 0xc54   :  { %1501 = vmatprep.mubr.msk.bf16.mxu1 %vm1565_vm0, %v1564_v3  ;;  %v1143_v3 = vpack.c.bf16 %v1076_v37, %v1076_v37  ;;  %1500 = vmatpush3.bf16.msra.mxu1 %v128_v43 }
 0xc56   :  { %v1148_v40 = vsel %vm327_vm4, %v1143_v3, 0 }
 0xc57   :  { %1494 = vmatpush3.bf16.msra.mxu0 %v1148_v40 }
 0xd26   :  { %v1124_v27 = vpop.f32.mrb[32].mxu1 }
 0xd27   :  { %v1491_v28 = vpop.f32.mrb[33].mxu1  ;;  %v1130_v29 = vsel %vm309_vm3, %v1124_v27, -inf }
 0xd28   :  { %1131 = vmax.xlane.f32.xlu0 %v1130_v29  ;;  %v1127_v30 = vpop.f32.mrb[34].mxu1 }
 0xd29   :  { %v1492_v31 = vpop.f32.mrb[35].mxu1 }
 0xdb5   :  { %v1132_v32 = vpop.xlane.xlu0 %1131 }
 0xdb6   :  { %v1133_v33 = vsub.f32 %v1124_v27, %v1132_v32 }
 0xdb8   :  { %v1134_v34 = vmul.f32 1.442695, %v1133_v33 }
 0xdba   :  { %1536 = vpow2.f32 %v1134_v34 }
 0xdc4   :  { %v1537_v35 = vpop.eup %1536 }
 0xdc5   :  { %v1136_v36 = vsel %vm309_vm3, %v1537_v35, 0.0 }
 0xdc6   :  { %1137 = vadd.xlane.f32.xlu0 %v1136_v36 }
 0xe53   :  { %v1138_v44 = vpop.xlane.xlu0 %1137 }
 0xe54   :  { %1538 = vrcp.f32 %v1138_v44 }
 0xe5e   :  { %v1539_v45 = vpop.eup %1538 }
 0xe5f   :  { %v1140_v46 = vmul.f32 %v1539_v45, %v1537_v35 }
 0xe61   :  { %v1141_v47 = vmul.f32 %v1701_v57, %v1140_v46 }
 0xe63   :  { %v1142_v48 = vpack.c.bf16 %v1141_v47, %v1141_v47 }
 0xe65   :  { %1496 = vmatmul.mubr.msk.bf16.vlgmr.msra.gmra.mrb[44].mxu0 %vm309_vm3, %v1142_v48 }
 0xf38   :  { %v1184_v49 = vpop.f32.mrb[44].mxu0 }
 0xf39   :  { %v1190_v50 = vpack.c.bf16 %v1184_v49, %v1184_v49  ;;  %v1497_v51 = vpop.f32.mrb[45].mxu0 }
 0xf3a   :  { %v1187_v52 = vpop.f32.mrb[46].mxu0 }
 0xf3b   :  { %v1498_v53 = vpop.f32.mrb[47].mxu0  ;;  %1502 = vmatmul.mubr.msk.bf16.vlgmr.msra.gmra.mrb[8].mxu1 %vm262_vm2, %v1190_v50 }
0x100e   :  { %v1228_v55 = vpop.f32.mrb[8].mxu1 }
0x100f   :  { %v1505_v56 = vadd.f32 %v1252_v54, %v1228_v55  ;;  %v1503_v58 = vpop.f32.mrb[9].mxu1 }
0x1010   :  { %v1231_v57 = vpop.f32.mrb[10].mxu1 }
0x1011   :  { %1235 = vst.msk [vmem:[#allocation2] sm:$0xff] %vm136_vm1, %v1505_v56  ;;  %v1504_v59 = vpop.f32.mrb[11].mxu1 }
0x1012   :  { %1551 = shalt.err (!%p1548_p4)
}
0x1013   :  { %s1552_s7 = scalar_lea.hbm %s1959_s8, 128 }
0x1014   :  { %p1553_p5 = scmp.ne.s32.totalorder %s1959_s8, %s1552_s7  ;;  %p1556_p6 = scmp.lt.u32.totalorder %s1552_s7, %s1959_s8 }
0x1016   :  { %p1558_p7 = pnand %p1556_p6, %p1553_p5 }
0x1018   :  { %1561 = shalt.err (!%p1558_p7)
}
0x1019   :  { %1245 = dma.vmem_to_hbm [thread:$0]  %s1243_s22, 128, %s1959_s8, [#allocation3]  }
0x101a   :  { %1562 = dma.done.wait [#allocation3], 128  }
0x101b   :  { %1563 = vsyncadd [#allocation3], 4294967168 }
0x101c   :  { %1249 = vsyncpa [#allocation3], 1 }

</bundles_post_ra>
